<compile_context>
chip_gen: v6e
topology: v6e:2x2x1
jax: 0.10.0
libtpu: 0.0.40
codegen_flags: <defaults>
</compile_context>

<pallas_src>
import functools

import jax
import jax.numpy as jnp
from jax.experimental import pallas as pl
from jax.experimental.pallas import tpu as pltpu


def _pow_static(x, gamma):
    """x**gamma with static gamma; small integer gamma becomes VPU multiplies."""
    if isinstance(gamma, int) and 0 <= gamma <= 8:
        if gamma == 0:
            return jnp.ones_like(x)
        y = x
        for _ in range(gamma - 1):
            y = y * x
        return y
    return x ** gamma


def _focal_loss_kernel(logit_ref, tgt_ref, out_ref, *, gamma, L, TL):
    # logit_ref: (BN, C, TL) input dtype; tgt_ref: (BN, 1, TL) int
    # out_ref:   (1, 1, 1, 1) f32 per-(batch-group, L-tile) partial sum
    li = pl.program_id(1)

    x = logit_ref[...].astype(jnp.float32)              # (BN, C, TL)
    t = tgt_ref[...].astype(jnp.int32)                  # (BN, 1, TL)

    # softmax statistics over the class (sublane) axis
    m = jnp.max(x, axis=1, keepdims=True)                # (BN, 1, TL)
    z = x - m                                            # (BN, C, TL), <= 0
    s = jnp.sum(jnp.exp(z), axis=1, keepdims=True)       # (BN, 1, TL)

    # select the target-class shifted logit with one masked reduce over C
    cls = jax.lax.broadcasted_iota(jnp.int32, x.shape, dimension=1)
    z_t = jnp.sum(jnp.where(cls == t, z, 0.0), axis=1, keepdims=True)  # (BN,1,TL)

    logp_t = z_t - jnp.log(s)                            # (BN, 1, TL)
    p_t = jnp.exp(logp_t)                                # EUP slot; replaces e_t / s
    contrib = -(_pow_static(1.0 - p_t, gamma) * logp_t)  # (BN, 1, TL)

    def _store(vals):
        red = jnp.sum(vals, axis=2, keepdims=True)       # lane reduce (XLU)
        out_ref[...] = jnp.sum(red, axis=0, keepdims=True)[None]  # (1,1,1,1)

    if L % TL != 0:
        # Only the final L tile pays the remainder mask.
        n_last = pl.num_programs(1) - 1

        @pl.when(li == n_last)
        def _():
            col = li * TL + jax.lax.broadcasted_iota(jnp.int32, contrib.shape, 2)
            _store(jnp.where(col < L, contrib, 0.0))

        @pl.when(li != n_last)
        def _():
            _store(contrib)
    else:
        _store(contrib)


def _plan_tiles(N, C, L, logit_dtype, tgt_itemsize):
    """Pick (bn, lane_tile, vmem_limit) from padded VMEM footprint + HW generation."""
    itemsize = jnp.dtype(logit_dtype).itemsize
    sub = {4: 8, 2: 16, 1: 32}.get(itemsize, 8)
    padded_C = pl.cdiv(C, sub) * sub                     # rows the (C, tl) block occupies

    try:
        vmem_cap = int(pltpu.get_tpu_info().vmem_capacity_bytes)
    except Exception:
        vmem_cap = 128 * 1024 * 1024

    if vmem_cap <= 64 * 1024 * 1024:                     # v7x: 64 MiB per TensorCore
        vmem_limit = 48 * 1024 * 1024
        target_logit_bytes = 2 * 1024 * 1024
    else:                                                # v5e / v6e: 128 MiB
        vmem_limit = 64 * 1024 * 1024
        target_logit_bytes = 6 * 1024 * 1024

    # Padded VMEM bytes per lane, per batch element, of one grid step:
    #   double-buffered logit block + double-buffered target block (1->8 rows)
    #   + f32 temporaries (x/z/e at padded-C rows, ~5 single-row values, 8-row padded).
    per_lane = (2 * padded_C * itemsize
                + 2 * 8 * max(int(tgt_itemsize), 1)
                + 3 * max(padded_C, 8) * 4
                + 5 * 8 * 4)
    budget = int(vmem_limit * 0.6)

    L128 = pl.cdiv(L, 128) * 128
    tl = (target_logit_bytes // max(1, C * itemsize)) // 128 * 128
    tl_vmem = (budget // per_lane) // 128 * 128
    tl = int(max(128, min(tl, tl_vmem, L128)))

    # Batch several elements per grid step for small images (amortizes the
    # ~0.35 us/step fixed overhead); bn must divide N (no batch-dim masking).
    bn_cap = min(N,
                 max(1, budget // (per_lane * tl)),
                 max(1, target_logit_bytes // max(1, C * tl * itemsize)),
                 4096)
    bn = 1
    for d in range(1, int(bn_cap) + 1):
        if N % d == 0:
            bn = d
    return bn, tl, vmem_limit


def focal_loss_pallas(logit_nchw, mask, gamma=2):
    """logit_nchw: (N, C, H, W) float (f32/bf16), mask: (N, H, W) int -> scalar loss."""
    N, C, H, W = logit_nchw.shape
    L = H * W

    # Free views only: classes on sublanes, spatial L on the 128-lane axis.
    logits = logit_nchw.reshape(N, C, L)
    if mask.dtype.itemsize > 4:
        mask = mask.astype(jnp.int32)                    # TPU has no 64-bit int path
    targets = mask.reshape(N, 1, L)                      # native int dtype, cast in-kernel

    bn, tl, vmem_limit = _plan_tiles(N, C, L, logits.dtype, targets.dtype.itemsize)
    n_l = pl.cdiv(L, tl)
    grid = (N // bn, n_l)

    kernel = functools.partial(_focal_loss_kernel, gamma=gamma, L=L, TL=tl)

    partials = pl.pallas_call(
        kernel,
        out_shape=jax.ShapeDtypeStruct((N // bn, n_l, 1, 1), jnp.float32),
        grid_spec=pltpu.PrefetchScalarGridSpec(
            num_scalar_prefetch=0,
            grid=grid,
            in_specs=[
                pl.BlockSpec((bn, C, tl), lambda g, l: (g, 0, l)),
                pl.BlockSpec((bn, 1, tl), lambda g, l: (g, 0, l)),
            ],
            out_specs=pl.BlockSpec((1, 1, 1, 1), lambda g, l: (g, l, 0, 0)),
        ),
        compiler_params=pltpu.CompilerParams(
            dimension_semantics=("parallel", "parallel"),
            vmem_limit_bytes=vmem_limit,
        ),
    )(logits, targets)

    return jnp.sum(partials) / jnp.float32(N * L)


def focal_loss_ref(logit_nchw, mask, gamma=2):
    """Pure-JAX reference mirroring the PyTorch module."""
    N, C, H, W = logit_nchw.shape
    logit = logit_nchw.reshape(N, C, H * W).astype(jnp.float32)
    target = mask.reshape(N, H * W)
    p = jax.nn.softmax(logit, axis=1)
    logp = jax.nn.log_softmax(logit, axis=1)
    weighted = (1.0 - p) ** gamma * logp
    picked = jnp.take_along_axis(weighted, target[:, None, :], axis=1)[:, 0, :]
    return jnp.mean(-picked)


if __name__ == "__main__":
    key = jax.random.PRNGKey(0)
    k1, k2 = jax.random.split(key)
    N, C, H, W = 2, 4, 16, 16
    logit = jax.random.normal(k1, (N, C, H, W), dtype=jnp.float32)
    mask = jax.random.randint(k2, (N, H, W), 0, C, dtype=jnp.int32)

    out = focal_loss_pallas(logit, mask, gamma=2)
    out = jax.block_until_ready(out)

    ref = focal_loss_ref(logit, mask, gamma=2)
    assert jnp.allclose(out, ref, rtol=1e-5, atol=1e-5), (out, ref)
    print("KERNEL_OK")
</pallas_src>

<mosaic_0001>
module attributes {stable_mosaic.version = 11 : i64} {
  func.func @_focal_loss_kernel(%arg0: i32, %arg1: i32, %arg2: memref<2x4x256xf32, #tpu.memory_space<vmem>>, %arg3: memref<2x1x256xi32, #tpu.memory_space<vmem>>, %arg4: memref<1x1x1x1xf32, #tpu.memory_space<vmem>>) attributes {dimension_semantics = [#tpu.dimension_semantics<parallel>, #tpu.dimension_semantics<parallel>], iteration_bounds = array<i64: 1, 1>, scalar_prefetch = 0 : i64, scratch_operands = 0 : i64, tpu.core_type = #tpu.core_type<tc>, window_params = [{transform_indices = @transform_0, window_bounds = array<i64: 2, 4, 256>}, {transform_indices = @transform_1, window_bounds = array<i64: 2, 1, 256>}, {transform_indices = @transform_2, window_bounds = array<i64: 1, 1, 1, 1>}]} {
    %c0 = arith.constant 0 : index
    %c0_0 = arith.constant 0 : index
    %c0_1 = arith.constant 0 : index
    %0 = vector.load %arg2[%c0, %c0_0, %c0_1] : memref<2x4x256xf32, #tpu.memory_space<vmem>>, vector<2x4x256xf32>
    %c0_2 = arith.constant 0 : index
    %c0_3 = arith.constant 0 : index
    %c0_4 = arith.constant 0 : index
    %1 = vector.load %arg3[%c0_2, %c0_3, %c0_4] : memref<2x1x256xi32, #tpu.memory_space<vmem>>, vector<2x1x256xi32>
    %cst = arith.constant dense<0xFF800000> : vector<2x256xf32>
    %2 = vector.multi_reduction <maximumf>, %0, %cst [1] : vector<2x4x256xf32> to vector<2x256xf32>
    %3 = vector.shape_cast %2 : vector<2x256xf32> to vector<2x1x256xf32>
    %4 = vector.broadcast %3 : vector<2x1x256xf32> to vector<2x4x256xf32>
    %5 = arith.subf %0, %4 : vector<2x4x256xf32>
    %6 = math.exp %5 : vector<2x4x256xf32>
    %cst_5 = arith.constant dense<0.000000e+00> : vector<2x256xf32>
    %7 = vector.multi_reduction <add>, %6, %cst_5 [1] : vector<2x4x256xf32> to vector<2x256xf32>
    %8 = vector.shape_cast %7 : vector<2x256xf32> to vector<2x1x256xf32>
    %9 = tpu.iota {dimensions = array<i32: 1>} : vector<2x4x256xi32>
    %10 = vector.broadcast %1 : vector<2x1x256xi32> to vector<2x4x256xi32>
    %11 = arith.cmpi eq, %9, %10 : vector<2x4x256xi32>
    %cst_6 = arith.constant 0.000000e+00 : f32
    %12 = vector.broadcast %cst_6 : f32 to vector<2x4x256xf32>
    %13 = arith.select %11, %5, %12 : vector<2x4x256xi1>, vector<2x4x256xf32>
    %cst_7 = arith.constant dense<0.000000e+00> : vector<2x256xf32>
    %14 = vector.multi_reduction <add>, %13, %cst_7 [1] : vector<2x4x256xf32> to vector<2x256xf32>
    %15 = vector.shape_cast %14 : vector<2x256xf32> to vector<2x1x256xf32>
    %16 = math.log %8 : vector<2x1x256xf32>
    %17 = arith.subf %15, %16 : vector<2x1x256xf32>
    %18 = math.exp %17 : vector<2x1x256xf32>
    %cst_8 = arith.constant 1.000000e+00 : f32
    %19 = vector.broadcast %cst_8 : f32 to vector<2x1x256xf32>
    %20 = arith.subf %19, %18 : vector<2x1x256xf32>
    %21 = arith.mulf %20, %20 : vector<2x1x256xf32>
    %22 = arith.mulf %21, %17 : vector<2x1x256xf32>
    %cst_9 = arith.constant 0.000000e+00 : f32
    %23 = vector.broadcast %cst_9 : f32 to vector<2x1x256xf32>
    %24 = arith.subf %23, %22 : vector<2x1x256xf32>
    %cst_10 = arith.constant dense<0.000000e+00> : vector<2x1xf32>
    %25 = vector.multi_reduction <add>, %24, %cst_10 [2] : vector<2x1x256xf32> to vector<2x1xf32>
    %26 = vector.shape_cast %25 : vector<2x1xf32> to vector<2x1x1xf32>
    %cst_11 = arith.constant dense<0.000000e+00> : vector<1x1xf32>
    %27 = vector.multi_reduction <add>, %26, %cst_11 [0] : vector<2x1x1xf32> to vector<1x1xf32>
    %28 = vector.shape_cast %27 : vector<1x1xf32> to vector<1x1x1xf32>
    %29 = vector.shape_cast %28 : vector<1x1x1xf32> to vector<1x1x1x1xf32>
    %c0_12 = arith.constant 0 : index
    %c0_13 = arith.constant 0 : index
    %c0_14 = arith.constant 0 : index
    %c0_15 = arith.constant 0 : index
    %30 = vector.load %arg4[%c0_12, %c0_13, %c0_14, %c0_15] : memref<1x1x1x1xf32, #tpu.memory_space<vmem>>, vector<1x1x1x1xf32>
    tpu.vector_store %arg4[%c0_12, %c0_13, %c0_14, %c0_15], %29 {strides = array<i32>} : memref<1x1x1x1xf32, #tpu.memory_space<vmem>>, vector<1x1x1x1xf32>,
    return
  }
  func.func @transform_0(%arg0: i32, %arg1: i32) -> (i32, i32, i32) {
    %c0_i32 = arith.constant 0 : i32
    %c0_i32_0 = arith.constant 0 : i32
    return %arg0, %c0_i32, %arg1 : i32, i32, i32
  }
  func.func @transform_1(%arg0: i32, %arg1: i32) -> (i32, i32, i32) {
    %c0_i32 = arith.constant 0 : i32
    %c0_i32_0 = arith.constant 0 : i32
    return %arg0, %c0_i32, %arg1 : i32, i32, i32
  }
  func.func @transform_2(%arg0: i32, %arg1: i32) -> (i32, i32, i32, i32) {
    %c0_i32 = arith.constant 0 : i32
    %c0_i32_0 = arith.constant 0 : i32
    %c0_i32_1 = arith.constant 0 : i32
    return %arg0, %arg1, %c0_i32, %c0_i32_0 : i32, i32, i32, i32
  }
}

</mosaic_0001>

<bundles_post_ra>
// kernel: tpu_custom_call.1
= control target key start
LH: loop header
LB: loop body
LE: loop exit
PB: predicated region body
PF: predicated region fallthrough
CT: control target
= control target key end

     0   :  { %7 = vsyncpa [#allocation3], 0  ;;  %s386_s0 = inlined_call_operand.hbm [shape: f32[2,4,256], index: 0, kind: input, shape index: {}]   ;;  %s387_s1 = inlined_call_operand.hbm [shape: s32[2,1,256], index: 1, kind: input, shape index: {}]   ;;  %s388_s2 = inlined_call_operand.hbm [shape: f32[1,1,1,1], index: 2, kind: output, shape index: {}]  }
   0x1   :  { %8 = vsyncpa [#allocation6], 0 }
   0x2   :  { %9 = vsyncpa [#allocation4], 0  ;;  %s343_s9 = smov [#allocation2]  }
   0x3   :  { %s15_s10 = sshll.u32 %s343_s9, 4  ;;  %s16_s10 = int_to_ptr.vmem [resolvable:$true] %s15_s10 }
   0x4   :  { %s285_s11 = scalar_lea.vmem %s16_s10, 256  ;;  %p290_p1 = scmp.lt.s32.totalorder %s16_s10, %s16_s10 }
   0x5   :  { %p286_p0 = scmp.ne.s32.totalorder %s16_s10, %s285_s11  ;;  %p291_p2 = scmp.lt.s32.totalorder %s285_s11, %s285_s11 }
   0x7   :  { %p292_p3 = por %p291_p2, %p290_p1 }
   0x9   :  { %p293_p4 = pnand %p292_p3, %p286_p0 }
   0xb   :  { %296 = shalt.err (!%p293_p4)
}
   0xc   :  { %s344_s12 = smov 128   ;;  %s345_s13 = smov 8  }
   0xd   :  { %21 = dma.hbm_to_vmem [thread:$0]  %s386_s0, 256, %s16_s10, [#allocation3], %s344_s12, %s344_s12, %s345_s13  }
   0xe   :  { %s346_s16 = smov [#allocation5]  }
   0xf   :  { %s27_s17 = sshll.u32 %s346_s16, 4  ;;  %s28_s17 = int_to_ptr.vmem [resolvable:$true] %s27_s17 }
  0x10   :  { %s305_s18 = scalar_lea.vmem %s28_s17, 64  ;;  %p310_p6 = scmp.lt.s32.totalorder %s28_s17, %s28_s17 }
  0x11   :  { %p306_p5 = scmp.ne.s32.totalorder %s28_s17, %s305_s18  ;;  %p311_p7 = scmp.lt.s32.totalorder %s305_s18, %s305_s18 }
  0x13   :  { %p312_p8 = por %p311_p7, %p310_p6 }
  0x15   :  { %p313_p9 = pnand %p312_p8, %p306_p5 }
  0x17   :  { %316 = shalt.err (!%p313_p9)
}
  0x18   :  { %s347_s19 = smov 32   ;;  %s348_s20 = smov 2  }
  0x19   :  { %33 = dma.hbm_to_vmem [thread:$0]  %s387_s1, 64, %s28_s17, [#allocation6], %s347_s19, %s347_s19, %s348_s20  }
  0x1a   :  { %337 = dma.done.wait [#allocation3], 256  }
  0x1b   :  { %338 = vsyncadd [#allocation3], 4294967040 }
  0x1c   :  { %339 = dma.done.wait [#allocation6], 64  }
  0x1d   :  { %340 = vsyncadd [#allocation6], 4294967232  ;;  %vm50_vm0 = vcmask 1043456   ;;  %v40_v0 = vld [vmem:[#allocation2] sm:$0xff]  ;;  %v41_v1 = vld [vmem:[#allocation2 + $0x8] sm:$0xff]  ;;  %v127_v33 = vlaneseq  ;;  %s349_s0 = smov [#allocation7]  }
  0x1e   :  { %v46_v2 = vcombine.high %v40_v0, %v40_v0  ;;  %v51_v3 = vsel %vm50_vm0, %v40_v0, -inf  ;;  %v47_v5 = vcombine.high %v41_v1, %v41_v1  ;;  %v65_v6 = vsel %vm50_vm0, %v41_v1, -inf  ;;  %v42_v41 = vld [vmem:[#allocation5] sm:$0x3]  ;;  %v43_v43 = vld [vmem:[#allocation5 + $0x2] sm:$0x3] }
  0x1f   :  { %v52_v4 = vrot.slane %v51_v3, 4  ;;  %v66_v8 = vrot.slane %v65_v6, 4  ;;  %v128_v38 = vshrl.u32 %v127_v33, 7  ;;  %s238_s1 = sshll.u32 %s349_s0, 4  ;;  %vm230_vm5 = vcmask 0   ;;  %s239_s1 = int_to_ptr.vmem [resolvable:$true] %s238_s1 }
  0x20   :  { %v58_v7 = vsel %vm50_vm0, %v46_v2, -inf  ;;  %v72_v11 = vsel %vm50_vm0, %v47_v5, -inf  ;;  %s317_s23 = scalar_lea.vmem %s239_s1, 16  ;;  %s321_s24 = scalar_lea.vmem %s239_s1, 32 }
  0x21   :  { %v53_v9 = vmax.f32 %v51_v3, %v52_v4  ;;  %v59_v10 = vrot.slane %v58_v7, 4  ;;  %v67_v12 = vmax.f32 %v65_v6, %v66_v8  ;;  %v73_v13 = vrot.slane %v72_v11, 4  ;;  %p318_p10 = scmp.ne.s32.totalorder %s239_s1, %s317_s23  ;;  %p322_p11 = scmp.lt.s32.totalorder %s239_s1, %s239_s1 }
  0x22   :  { %v131_v40 = vsub.s32 0, %v128_v38  ;;  %v135_v42 = vsub.s32 1, %v128_v38  ;;  %p323_p12 = scmp.lt.s32.totalorder %s321_s24, %s317_s23 }
  0x23   :  { %v54_v14 = vrot.slane %v53_v9, 2  ;;  %v60_v15 = vmax.f32 %v58_v7, %v59_v10  ;;  %v68_v16 = vrot.slane %v67_v12, 2  ;;  %v74_v17 = vmax.f32 %v72_v11, %v73_v13 }
  0x24   :  { %v132_v44 = vrot.slane %v42_v41, %v131_v40  ;;  %v140_v45 = vrot.slane %v43_v43, %v131_v40  ;;  %v136_v46 = vrot.slane %v42_v41, %v135_v42  ;;  %v144_v47 = vrot.slane %v43_v43, %v135_v42  ;;  %p324_p13 = por %p323_p12, %p322_p11 }
  0x25   :  { %v55_v18 = vmax.f32 %v53_v9, %v54_v14  ;;  %v61_v19 = vrot.slane %v60_v15, 2  ;;  %v69_v20 = vmax.f32 %v67_v12, %v68_v16  ;;  %v75_v21 = vrot.slane %v74_v17, 2 }
  0x26   :  { %vm145_vm1 = vcmp.eq.s32.totalorder %v128_v38, %v132_v44  ;;  %vm147_vm2 = vcmp.eq.s32.totalorder %v128_v38, %v140_v45  ;;  %vm146_vm3 = vcmp.eq.s32.totalorder %v128_v38, %v136_v46  ;;  %vm148_vm4 = vcmp.eq.s32.totalorder %v128_v38, %v144_v47  ;;  %p325_p0 = pnand %p324_p13, %p318_p10 }
  0x27   :  { %v56_v22 = vrot.slane %v55_v18, 1  ;;  %v62_v23 = vmax.f32 %v60_v15, %v61_v19  ;;  %v70_v24 = vrot.slane %v69_v20, 1  ;;  %v76_v25 = vmax.f32 %v74_v17, %v75_v21 }
  0x29   :  { %v57_v26 = vmax.f32 %v55_v18, %v56_v22  ;;  %v63_v27 = vrot.slane %v62_v23, 1  ;;  %v71_v28 = vmax.f32 %v69_v20, %v70_v24  ;;  %v77_v29 = vrot.slane %v76_v25, 1 }
  0x2b   :  { %v64_v30 = vmax.f32 %v62_v23, %v63_v27  ;;  %v78_v31 = vmax.f32 %v76_v25, %v77_v29 }
  0x2d   :  { %v83_v32 = vcombine.low %v57_v26, %v64_v30  ;;  %v84_v34 = vcombine.low %v71_v28, %v78_v31 }
  0x2f   :  { %v87_v35 = vsub.f32 %v40_v0, %v83_v32  ;;  %v88_v36 = vsub.f32 %v41_v1, %v84_v34 }
  0x31   :  { %v89_v37 = vmul.f32 1.442695, %v87_v35  ;;  %v91_v39 = vmul.f32 1.442695, %v88_v36  ;;  %v151_v48 = vcombine.high %v87_v35, %v87_v35  ;;  %v152_v49 = vcombine.high %v88_v36, %v88_v36 }
  0x32   :  { %v155_v51 = vsel %vm145_vm1, %v87_v35, 0.0  ;;  %v157_v55 = vsel %vm147_vm2, %v88_v36, 0.0 }
  0x33   :  { %257 = vpow2.f32 %v89_v37  ;;  %v156_v57 = vsel %vm146_vm3, %v151_v48, 0.0  ;;  %v159_v61 = vsel %vm50_vm0, %v155_v51, 0.0  ;;  %v158_v63 = vsel %vm148_vm4, %v152_v49, 0.0 }
  0x34   :  { %259 = vpow2.f32 %v91_v39  ;;  %v173_v3 = vsel %vm50_vm0, %v157_v55, 0.0  ;;  %v166_v4 = vsel %vm50_vm0, %v156_v57, 0.0  ;;  %v160_v9 = vrot.slane %v159_v61, 4 }
  0x35   :  { %v180_v10 = vsel %vm50_vm0, %v158_v63, 0.0  ;;  %v174_v13 = vrot.slane %v173_v3, 4  ;;  %v167_v16 = vrot.slane %v166_v4, 4 }
  0x36   :  { %v181_v19 = vrot.slane %v180_v10, 4  ;;  %v161_v22 = vadd.f32 %v160_v9, %v159_v61 }
  0x37   :  { %v175_v25 = vadd.f32 %v174_v13, %v173_v3  ;;  %v168_v28 = vadd.f32 %v167_v16, %v166_v4 }
  0x38   :  { %v182_v31 = vadd.f32 %v181_v19, %v180_v10  ;;  %v162_v33 = vrot.slane %v161_v22, 2 }
  0x39   :  { %v176_v35 = vrot.slane %v175_v25, 2  ;;  %v169_v36 = vrot.slane %v168_v28, 2 }
  0x3a   :  { %v183_v37 = vrot.slane %v182_v31, 2  ;;  %v163_v38 = vadd.f32 %v162_v33, %v161_v22 }
  0x3b   :  { %v177_v39 = vadd.f32 %v176_v35, %v175_v25  ;;  %v170_v40 = vadd.f32 %v169_v36, %v168_v28 }
  0x3c   :  { %v184_v41 = vadd.f32 %v183_v37, %v182_v31  ;;  %v164_v42 = vrot.slane %v163_v38, 1 }
  0x3d   :  { %v178_v43 = vrot.slane %v177_v39, 1  ;;  %v171_v44 = vrot.slane %v170_v40, 1 }
  0x3e   :  { %v185_v45 = vrot.slane %v184_v41, 1  ;;  %v165_v46 = vadd.f32 %v164_v42, %v163_v38 }
  0x3f   :  { %v179_v48 = vadd.f32 %v178_v43, %v177_v39 }
  0x40   :  { %v258_v50 = vpop.eup %257 }
  0x41   :  { %v260_v52 = vpop.eup %259  ;;  %v95_v53 = vcombine.high %v258_v50, %v258_v50  ;;  %v99_v54 = vsel %vm50_vm0, %v258_v50, 0.0  ;;  %v172_v50 = vadd.f32 %v171_v44, %v170_v40 }
  0x42   :  { %v100_v56 = vrot.slane %v99_v54, 4  ;;  %v96_v58 = vcombine.high %v260_v52, %v260_v52  ;;  %v113_v59 = vsel %vm50_vm0, %v260_v52, 0.0 }
  0x43   :  { %v106_v60 = vsel %vm50_vm0, %v95_v53, 0.0  ;;  %v114_v62 = vrot.slane %v113_v59, 4  ;;  %v186_v53 = vadd.f32 %v185_v45, %v184_v41 }
  0x44   :  { %v101_v0 = vadd.f32 %v100_v56, %v99_v54  ;;  %v107_v1 = vrot.slane %v106_v60, 4  ;;  %v120_v2 = vsel %vm50_vm0, %v96_v58, 0.0 }
  0x45   :  { %v115_v5 = vadd.f32 %v114_v62, %v113_v59  ;;  %v121_v6 = vrot.slane %v120_v2, 4 }
  0x46   :  { %v102_v7 = vrot.slane %v101_v0, 2  ;;  %v108_v8 = vadd.f32 %v107_v1, %v106_v60 }
  0x47   :  { %v116_v11 = vrot.slane %v115_v5, 2  ;;  %v122_v12 = vadd.f32 %v121_v6, %v120_v2 }
  0x48   :  { %v103_v14 = vadd.f32 %v102_v7, %v101_v0  ;;  %v109_v15 = vrot.slane %v108_v8, 2 }
  0x49   :  { %v117_v17 = vadd.f32 %v116_v11, %v115_v5  ;;  %v123_v18 = vrot.slane %v122_v12, 2 }
  0x4a   :  { %v104_v20 = vrot.slane %v103_v14, 1  ;;  %v110_v21 = vadd.f32 %v109_v15, %v108_v8 }
  0x4b   :  { %v118_v23 = vrot.slane %v117_v17, 1  ;;  %v124_v24 = vadd.f32 %v123_v18, %v122_v12 }
  0x4c   :  { %v105_v26 = vadd.f32 %v104_v20, %v103_v14  ;;  %v111_v27 = vrot.slane %v110_v21, 1 }
  0x4d   :  { %v119_v29 = vadd.f32 %v118_v23, %v117_v17  ;;  %v125_v30 = vrot.slane %v124_v24, 1 }
  0x4e   :  { %v112_v32 = vadd.f32 %v111_v27, %v110_v21  ;;  %261 = vlog2.f32 %v105_v26 }
  0x4f   :  { %v126_v34 = vadd.f32 %v125_v30, %v124_v24  ;;  %263 = vlog2.f32 %v119_v29 }
  0x50   :  { %265 = vlog2.f32 %v112_v32 }
  0x51   :  { %267 = vlog2.f32 %v126_v34 }
  0x5b   :  { %v262_v47 = vpop.eup %261 }
  0x5c   :  { %v264_v49 = vpop.eup %263  ;;  %v188_v51 = vmul.f32 0.6931472, %v262_v47 }
  0x5d   :  { %v266_v52 = vpop.eup %265  ;;  %v192_v54 = vmul.f32 0.6931472, %v264_v49 }
  0x5e   :  { %v268_v55 = vpop.eup %267  ;;  %v190_v56 = vmul.f32 0.6931472, %v266_v52  ;;  %v195_v57 = vsub.f32 %v165_v46, %v188_v51 }
  0x5f   :  { %v194_v58 = vmul.f32 0.6931472, %v268_v55  ;;  %v197_v59 = vsub.f32 %v179_v48, %v192_v54 }
  0x60   :  { %v196_v60 = vsub.f32 %v172_v50, %v190_v56  ;;  %v199_v61 = vmul.f32 1.442695, %v195_v57 }
  0x61   :  { %v198_v62 = vsub.f32 %v186_v53, %v194_v58  ;;  %v203_v63 = vmul.f32 1.442695, %v197_v59 }
  0x62   :  { %269 = vpow2.f32 %v199_v61  ;;  %v201_v0 = vmul.f32 1.442695, %v196_v60 }
  0x63   :  { %271 = vpow2.f32 %v203_v63  ;;  %v205_v1 = vmul.f32 1.442695, %v198_v62 }
  0x64   :  { %273 = vpow2.f32 %v201_v0 }
  0x65   :  { %275 = vpow2.f32 %v205_v1 }
  0x6f   :  { %v270_v2 = vpop.eup %269 }
  0x70   :  { %v272_v3 = vpop.eup %271  ;;  %v207_v4 = vsub.f32 1.0, %v270_v2 }
  0x71   :  { %v274_v5 = vpop.eup %273  ;;  %v209_v6 = vsub.f32 1.0, %v272_v3 }
  0x72   :  { %v276_v7 = vpop.eup %275  ;;  %v208_v8 = vsub.f32 1.0, %v274_v5  ;;  %v211_v9 = vmul.f32 %v207_v4, %v207_v4 }
  0x73   :  { %v210_v10 = vsub.f32 1.0, %v276_v7  ;;  %v213_v11 = vmul.f32 %v209_v6, %v209_v6 }
  0x74   :  { %v212_v12 = vmul.f32 %v208_v8, %v208_v8  ;;  %v215_v13 = vmul.f32 %v211_v9, %v195_v57 }
  0x75   :  { %v214_v14 = vmul.f32 %v210_v10, %v210_v10  ;;  %v217_v15 = vmul.f32 %v213_v11, %v197_v59 }
  0x76   :  { %v216_v16 = vmul.f32 %v212_v12, %v196_v60  ;;  %v219_v17 = vsub.f32 0.0, %v215_v13 }
  0x77   :  { %v218_v18 = vmul.f32 %v214_v14, %v198_v62  ;;  %v221_v20 = vsub.f32 0.0, %v217_v15 }
  0x78   :  { %v220_v19 = vsub.f32 0.0, %v216_v16 }
  0x79   :  { %v222_v21 = vsub.f32 0.0, %v218_v18 }
  0x7a   :  { %v223_v22 = vadd.f32 %v220_v19, %v219_v17 }
  0x7b   :  { %v226_v23 = vadd.f32 %v222_v21, %v221_v20 }
  0x7c   :  { %224 = vadd.xlane.f32.xlu0 %v223_v22 }
  0x80   :  { %227 = vadd.xlane.f32.xlu0 %v226_v23 }
 0x105   :  { %v225_v24 = vpop.xlane.xlu0 %224 }
 0x109   :  { %v228_v25 = vpop.xlane.xlu0 %227 }
 0x10a   :  { %v229_v26 = vadd.f32 %v228_v25, %v225_v24 }
 0x10c   :  { %231 = vst.msk [vmem:[#allocation7] sm:$0x1] %vm230_vm5, %v229_v26 }
 0x10d   :  { %328 = shalt.err (!%p325_p0)
}
 0x10e   :  { %241 = dma.vmem_to_hbm [thread:$0]  %s239_s1, 16, %s388_s2, [#allocation4]  }
 0x10f   :  { %341 = dma.done.wait [#allocation4], 16  }
 0x110   :  { %342 = vsyncadd [#allocation4], 4294967280 }
 0x111   :  { %245 = vsyncpa [#allocation3], 1 }
 0x112   :  { %246 = vsyncpa [#allocation6], 1 }
 0x113   :  { %247 = vsyncpa [#allocation4], 1 }

</bundles_post_ra>
